<compile_context>
chip_gen: v6e
topology: v6e:2x2x1
jax: 0.10.0
libtpu: 0.0.40
codegen_flags: <defaults>
</compile_context>

<pallas_src>
import functools
import math

import jax
import jax.numpy as jnp
from jax.experimental import pallas as pl
from jax.experimental.pallas import tpu as pltpu

_LANE = 128
_VMEM_TILE_BUDGET = 24 * 1024 * 1024   # per-step pipeline budget (fits all gens)
_VMEM_LIMIT_BYTES = 32 * 1024 * 1024   # raise v5e's 16 MiB default scoped limit


def _round_up(n: int, m: int) -> int:
    return ((n + m - 1) // m) * m


def _cdiv(a: int, b: int) -> int:
    return (a + b - 1) // b


# ---------------------------------------------------------------------------
# In-kernel math helpers
# ---------------------------------------------------------------------------
def _exact_gelu(x):
    # nn.GELU() default = exact (erf) formulation (kept for semantic fidelity).
    # TODO(synk): consider tanh-approx GELU (EUP-native) on v7x if tolerance allows.
    return 0.5 * x * (1.0 + jax.lax.erf(x * (1.0 / math.sqrt(2.0))))


def _apply_mode(y, mode):
    # y: (TILE_B, 1) — the output-feature axis is axis 1 (size 1).
    if mode == "cls":
        return jax.nn.sigmoid(y)
    if mode == "mcls":
        # nn.Softmax(dim=1) over a (B, 1) tensor is identically 1.0.
        return jnp.ones_like(y)
    return y  # "reg"


# ---------------------------------------------------------------------------
# Kernels (native layout: batch on sublanes, features on lanes)
# ---------------------------------------------------------------------------
def _linear_head_kernel(x_ref, w_ref, b_ref, o_ref, *, mode):
    # x: (TILE_B, F), w: (F, 1), b: (1, 1)  ->  o: (TILE_B, 1)
    y = jnp.dot(x_ref[...], w_ref[...], preferred_element_type=jnp.float32)
    y = y + b_ref[...]
    o_ref[...] = _apply_mode(y, mode).astype(o_ref.dtype)


def _mlp_head_kernel(x_ref, w1_ref, b1_ref, w2_ref, b2_ref, o_ref, *, mode):
    # x: (TILE_B, F), w1: (F, H), b1: (1, H), w2: (H, 1), b2: (1, 1)
    h = jnp.dot(x_ref[...], w1_ref[...], preferred_element_type=jnp.float32)
    h = _exact_gelu(h + b1_ref[...])
    y = jnp.dot(h, w2_ref[...], preferred_element_type=jnp.float32)
    y = y + b2_ref[...]
    o_ref[...] = _apply_mode(y, mode).astype(o_ref.dtype)


def _const_spec(shape):
    # Full-block, constant index_map: fetched once, resident across grid steps.
    return pl.BlockSpec(shape, lambda i: (0,) * len(shape))


# ---------------------------------------------------------------------------
# Module wrapper with deterministic parameter init (mimics nn.Linear init).
# ---------------------------------------------------------------------------
class PredictionHeadPallas:
    def __init__(self, input_size: int = 10, linear: bool = True, mode: str = "cls",
                 key=None):
        assert mode in ("cls", "mcls", "reg")
        self.input_size = input_size
        self.linear = linear
        self.mode = mode
        if key is None:
            key = jax.random.PRNGKey(0)

        def init_linear(k, fan_in, fan_out):
            kw, kb = jax.random.split(k)
            bound = 1.0 / math.sqrt(fan_in)
            w = jax.random.uniform(kw, (fan_in, fan_out), jnp.float32, -bound, bound)
            b = jax.random.uniform(kb, (fan_out,), jnp.float32, -bound, bound)
            return w, b

        if linear:
            w, b = init_linear(key, input_size, 1)
            self.w1 = w                          # (F, 1)
            self.b1 = b.reshape(1, 1)            # (1, 1)
            self.hidden = 0
        else:
            k1, k2 = jax.random.split(key)
            hidden = input_size // 2
            self.hidden = hidden
            w1, b1 = init_linear(k1, input_size, hidden)
            w2, b2 = init_linear(k2, hidden, 1)
            self.w1 = w1                         # (F, H)
            self.b1 = b1.reshape(1, hidden)      # (1, H)
            self.w2 = w2                         # (H, 1)
            self.b2 = b2.reshape(1, 1)           # (1, 1)

    def _tile_b(self, B: int, F: int) -> int:
        H = max(self.hidden, 1)
        # per-row pipeline bytes: double-buffered input + hidden/GELU f32 temps
        # + output/slack (all f32).
        bytes_per_row = 4 * (2 * F + 4 * H + 8)
        cap = max(_LANE, (_VMEM_TILE_BUDGET // bytes_per_row) // _LANE * _LANE)
        # Keep >= ~4 grid steps at large B so v7x's two TCs can split the
        # "parallel" batch axis (and pipelining stays active).
        want = _round_up(_cdiv(B, 4), _LANE)
        tile = min(cap, want)
        if tile >= B:
            return B  # single full-extent block (always layout-legal)
        return tile

    def __call__(self, x):
        B, F = x.shape
        assert F == self.input_size

        tile_b = self._tile_b(B, F)
        grid = (_cdiv(B, tile_b),)  # last block may be ragged; OOB rows are dropped

        x_spec = pl.BlockSpec((tile_b, F), lambda i: (i, 0))
        out_spec = pl.BlockSpec((tile_b, 1), lambda i: (i, 0))
        out_shape = jax.ShapeDtypeStruct((B, 1), x.dtype)
        cparams = pltpu.CompilerParams(
            dimension_semantics=("parallel",),
            vmem_limit_bytes=_VMEM_LIMIT_BYTES,
        )

        if self.linear:
            kernel = functools.partial(_linear_head_kernel, mode=self.mode)
            return pl.pallas_call(
                kernel,
                out_shape=out_shape,
                grid=grid,
                in_specs=[x_spec,
                          _const_spec(self.w1.shape),
                          _const_spec(self.b1.shape)],
                out_specs=out_spec,
                compiler_params=cparams,
            )(x, self.w1, self.b1)

        kernel = functools.partial(_mlp_head_kernel, mode=self.mode)
        return pl.pallas_call(
            kernel,
            out_shape=out_shape,
            grid=grid,
            in_specs=[x_spec,
                      _const_spec(self.w1.shape),
                      _const_spec(self.b1.shape),
                      _const_spec(self.w2.shape),
                      _const_spec(self.b2.shape)],
            out_specs=out_spec,
            compiler_params=cparams,
        )(x, self.w1, self.b1, self.w2, self.b2)


# ---------------------------------------------------------------------------
# Pure-JAX reference for sanity checks.
# ---------------------------------------------------------------------------
def _reference(head: PredictionHeadPallas, x):
    if head.linear:
        y = x @ head.w1 + head.b1
    else:
        h = _exact_gelu(x @ head.w1 + head.b1)
        y = h @ head.w2 + head.b2
    if head.mode == "cls":
        return jax.nn.sigmoid(y)
    if head.mode == "mcls":
        return jax.nn.softmax(y, axis=1)
    return y


if __name__ == "__main__":
    key = jax.random.PRNGKey(0)
    kx, kx2, kx3, kp1, kp2, kp3, kp4 = jax.random.split(key, 7)

    batch, input_size = 8, 32
    x = jax.random.normal(kx, (batch, input_size), jnp.float32)

    # 1) linear head, classification mode (sigmoid)
    head_lin = PredictionHeadPallas(input_size=input_size, linear=True, mode="cls", key=kp1)
    out_lin = jax.block_until_ready(head_lin(x))
    assert out_lin.shape == (batch, 1)
    assert jnp.allclose(out_lin, _reference(head_lin, x), atol=1e-5, rtol=1e-5)

    # 2) non-linear head (Linear -> GELU -> Linear), regression mode
    head_mlp = PredictionHeadPallas(input_size=input_size, linear=False, mode="reg", key=kp2)
    out_mlp = jax.block_until_ready(head_mlp(x))
    assert out_mlp.shape == (batch, 1)
    assert jnp.allclose(out_mlp, _reference(head_mlp, x), atol=1e-5, rtol=1e-5)

    # 3) default input_size=10 (H=5), degenerate "mcls" mode (softmax over size-1 dim)
    x10 = jax.random.normal(kx3, (batch, 10), jnp.float32)
    head_m = PredictionHeadPallas(input_size=10, linear=False, mode="mcls", key=kp4)
    out_m = jax.block_until_ready(head_m(x10))
    assert out_m.shape == (batch, 1)
    assert jnp.allclose(out_m, _reference(head_m, x10), atol=1e-5, rtol=1e-5)

    # 4) multi-tile batch with a ragged tail (exercises grid, weight residency,
    #    and OOB-row dropping on the last block)
    batch_big = 2600
    x_big = jax.random.normal(kx2, (batch_big, input_size), jnp.float32)
    head_big = PredictionHeadPallas(input_size=input_size, linear=False, mode="cls", key=kp3)
    out_big = jax.block_until_ready(head_big(x_big))
    assert out_big.shape == (batch_big, 1)
    assert jnp.allclose(out_big, _reference(head_big, x_big), atol=1e-5, rtol=1e-5)

    print("KERNEL_OK")
</pallas_src>

<mosaic_0001>
module attributes {stable_mosaic.version = 11 : i64} {
  func.func @_linear_head_kernel(%arg0: i32, %arg1: memref<8x32xf32, #tpu.memory_space<vmem>>, %arg2: memref<32x1xf32, #tpu.memory_space<vmem>>, %arg3: memref<1x1xf32, #tpu.memory_space<vmem>>, %arg4: memref<8x1xf32, #tpu.memory_space<vmem>>) attributes {dimension_semantics = [#tpu.dimension_semantics<parallel>], iteration_bounds = array<i64: 1>, scalar_prefetch = 0 : i64, scratch_operands = 0 : i64, tpu.core_type = #tpu.core_type<tc>, window_params = [{transform_indices = @transform_0, window_bounds = array<i64: 8, 32>}, {pipeline_mode = #tpu.pipeline_mode<synchronous>, transform_indices = @transform_1, window_bounds = array<i64: 32, 1>}, {pipeline_mode = #tpu.pipeline_mode<synchronous>, transform_indices = @transform_2, window_bounds = array<i64: 1, 1>}, {transform_indices = @transform_3, window_bounds = array<i64: 8, 1>}]} {
    %c0 = arith.constant 0 : index
    %c0_0 = arith.constant 0 : index
    %0 = vector.load %arg1[%c0, %c0_0] : memref<8x32xf32, #tpu.memory_space<vmem>>, vector<8x32xf32>
    %c0_1 = arith.constant 0 : index
    %c0_2 = arith.constant 0 : index
    %1 = vector.load %arg2[%c0_1, %c0_2] : memref<32x1xf32, #tpu.memory_space<vmem>>, vector<32x1xf32>
    %cst = arith.constant dense<0.000000e+00> : vector<8x1xf32>
    %2 = tpu.matmul %0, %1, %cst {dimension_numbers = #tpu.dot_dimension_numbers<[1], [0], [0], [1], [0, 0, 1, 1], [], []>} : vector<8x32xf32>, vector<32x1xf32>, vector<8x1xf32> -> vector<8x1xf32>
    %c0_3 = arith.constant 0 : index
    %c0_4 = arith.constant 0 : index
    %3 = vector.load %arg3[%c0_3, %c0_4] : memref<1x1xf32, #tpu.memory_space<vmem>>, vector<1x1xf32>
    %4 = vector.broadcast %3 : vector<1x1xf32> to vector<8x1xf32>
    %5 = arith.addf %2, %4 : vector<8x1xf32>
    %6 = arith.negf %5 : vector<8x1xf32>
    %7 = math.exp %6 : vector<8x1xf32>
    %cst_5 = arith.constant 1.000000e+00 : f32
    %8 = vector.broadcast %cst_5 : f32 to vector<8x1xf32>
    %9 = arith.addf %8, %7 : vector<8x1xf32>
    %10 = arith.divf %8, %9 : vector<8x1xf32>
    %c0_6 = arith.constant 0 : index
    %c0_7 = arith.constant 0 : index
    %11 = vector.load %arg4[%c0_6, %c0_7] : memref<8x1xf32, #tpu.memory_space<vmem>>, vector<8x1xf32>
    tpu.vector_store %arg4[%c0_6, %c0_7], %10 {strides = array<i32>} : memref<8x1xf32, #tpu.memory_space<vmem>>, vector<8x1xf32>,
    return
  }
  func.func @transform_0(%arg0: i32) -> (i32, i32) {
    %c0_i32 = arith.constant 0 : i32
    %c0_i32_0 = arith.constant 0 : i32
    return %arg0, %c0_i32 : i32, i32
  }
  func.func @transform_1(%arg0: i32) -> (i32, i32) {
    %c0_i32 = arith.constant 0 : i32
    %c0_i32_0 = arith.constant 0 : i32
    %c0_i32_1 = arith.constant 0 : i32
    return %c0_i32, %c0_i32_0 : i32, i32
  }
  func.func @transform_2(%arg0: i32) -> (i32, i32) {
    %c0_i32 = arith.constant 0 : i32
    %c0_i32_0 = arith.constant 0 : i32
    %c0_i32_1 = arith.constant 0 : i32
    return %c0_i32, %c0_i32_0 : i32, i32
  }
  func.func @transform_3(%arg0: i32) -> (i32, i32) {
    %c0_i32 = arith.constant 0 : i32
    %c0_i32_0 = arith.constant 0 : i32
    return %arg0, %c0_i32 : i32, i32
  }
}

</mosaic_0001>

<bundles_post_ra>
// kernel: tpu_custom_call.1
= control target key start
LH: loop header
LB: loop body
LE: loop exit
PB: predicated region body
PF: predicated region fallthrough
CT: control target
= control target key end

     0   :  { %v139_v0 = vmov 0.0   ;;  %vm140_vm0 = vmmov 0   ;;  %vm28_vm1 = vcmask 261120   ;;  %vm108_vm2 = vcmask 7168   ;;  %s182_s1 = inlined_call_operand.vmem [shape: f32[32,1], index: 1, kind: input, shape index: {}]   ;;  %s183_s2 = inlined_call_operand.<no memory space> [shape: f32[1,1], index: 2, kind: input, shape index: {}]   ;;  %s184_s0 = inlined_call_operand.vmem [shape: f32[8,32], index: 0, kind: input, shape index: {}]   ;;  %s185_s3 = inlined_call_operand.vmem [shape: f32[8,1], index: 3, kind: output, shape index: {}]  }
   0x1   :  { %122 = vmatprep.subr.mxu0 %v139_v0  ;;  %v20_v1 = vld [vmem:[%s182_s1 + $0x18] sm:$0xff]  ;;  %v19_v2 = vld [vmem:[%s182_s1 + $0x10] sm:$0xff]  ;;  %130 = vmatprep.mubr.msk.f32.mxu0 %vm140_vm0, %v139_v0  ;;  %v8_v3 = vstv %s183_s2  ;;  %v18_v4 = vld [vmem:[%s182_s1 + $0x8] sm:$0xff] }
   0x2   :  { %123 = vmatpush3.msra.mxu0 %v20_v1  ;;  %9 = vst [vmem:[#allocation2] sm:$0x1] %v8_v3  ;;  %v17_v5 = vld [vmem:[%s182_s1] sm:$0xff] }
   0x3   :  { %124 = vmatprep.subr.mxu0 %v139_v0  ;;  %v16_v6 = vld [vmem:[%s184_s0] sm:$0xff] }
   0x4   :  { %125 = vmatpush3.msra.mxu0 %v19_v2 }
   0x5   :  { %126 = vmatprep.subr.mxu0 %v139_v0 }
   0x6   :  { %127 = vmatpush3.msra.mxu0 %v18_v4 }
   0x7   :  { %128 = vmatprep.subr.mxu0 %v139_v0 }
   0x8   :  { %129 = vmatpush3.msra.mxu0 %v17_v5 }
   0x9   :  { %131 = vmatmul.mubr.msk.f32.vlgmr.msra.gmra.mxu0 %vm28_vm1, %v16_v6  ;;  %v114_v7 = vld [vmem:[#allocation2] ss:$0 sm:$0xff] }
  0xc9   :  { %v98_v8 = vpop.f32.mrf.mxu0 }
  0xca   :  { %v99_v9 = vadd.f32 %v114_v7, %v98_v8 }
  0xcb   :  { %v132_v10 = vpop.f32.mrf.mxu0 }
  0xcc   :  { %v116_v11 = vmul.f32 -1.442695, %v99_v9 }
  0xce   :  { %135 = vpow2.f32 %v116_v11 }
  0xdb   :  { %v136_v12 = vpop.eup %135 }
  0xdc   :  { %v105_v13 = vadd.f32 1.0, %v136_v12 }
  0xde   :  { %137 = vrcp.f32 %v105_v13 }
  0xeb   :  { %v138_v14 = vpop.eup %137 }
  0xec   :  { %109 = vst.msk [vmem:[%s185_s3] sm:$0xff] %vm108_vm2, %v138_v14 }

</bundles_post_ra>
